<compile_context>
chip_gen: v6e
topology: v6e:2x2x1
jax: 0.10.0
libtpu: 0.0.40
codegen_flags: <defaults>
</compile_context>

<pallas_src>
import functools
import math

import jax
import jax.numpy as jnp
from jax.experimental import pallas as pl
from jax.experimental.pallas import tpu as pltpu

_LANE = 128


def _mlp_value_kernel(x_ref, w1_ref, w2_ref, w3_ref, w4_ref, b_ref, o_ref, *,
                      mxu_dtype):
    """One batch tile of the 4-layer value MLP, feature-major layout.

    x_ref : (F, TB)   input tile, batch on lanes (mxu_dtype)
    w1_ref: (64, F)   layer-1 weight, PyTorch (out, in) layout (mxu_dtype)
    w2_ref: (64, 64)  layer-2 weight (mxu_dtype)
    w3_ref: (64, 64)  layer-3 weight (mxu_dtype)
    w4_ref: (64, 1)   layer-4 weight column, float32 (VPU/XLU path)
    b_ref : (64, 4)   packed biases: columns [b1 | b2 | b3 | b4-in-row-0], f32
    o_ref : (1, TB)   lane-dense output tile, float32
    """
    f32 = jnp.float32
    x = x_ref[...]                                                    # (F, TB)

    h = jnp.dot(w1_ref[...], x, preferred_element_type=f32)          # (64, TB)
    h = jnp.maximum(h + b_ref[:, 0:1], 0.0)
    h = jnp.dot(w2_ref[...], h.astype(mxu_dtype), preferred_element_type=f32)
    h = jnp.maximum(h + b_ref[:, 1:2], 0.0)
    h = jnp.dot(w3_ref[...], h.astype(mxu_dtype), preferred_element_type=f32)
    h = jnp.maximum(h + b_ref[:, 2:3], 0.0)

    # Final 64 -> 1 layer on VPU/XLU: multiply by the weight column and reduce
    # over sublanes.  Avoids a 1-wide MXU result and yields a lane-dense row.
    v = jnp.sum(h * w4_ref[...], axis=0, keepdims=True)              # (1, TB)
    o_ref[...] = v + b_ref[0:1, 3:4]


@functools.partial(jax.jit, static_argnames=("tile_b", "use_bf16"))
def onehot_value_forward(x, params, *, tile_b=1024, use_bf16=False):
    """x: (B, F) float32.  params: PyTorch-layout dict, w*: (out,in), b*: (out,)."""
    B, F = x.shape
    H = params["w1"].shape[0]                      # 64
    assert tile_b % _LANE == 0, "batch tile must be a multiple of 128 lanes"

    # --- choose the batch tile (batch lives on lanes) ---------------------
    B_lanes = max(_LANE, ((B + _LANE - 1) // _LANE) * _LANE)
    tile = min(tile_b, B_lanes)
    # Keep >= 2 grid steps when there is enough work (feeds both v7x TCs).
    if B_lanes >= 2 * _LANE and B_lanes // tile < 2:
        tile = max(_LANE, (B_lanes // 2) // _LANE * _LANE)
    n_tiles = pl.cdiv(B_lanes, tile)
    B_pad = n_tiles * tile
    grid = (B_pad // tile,)

    # --- wrapper-side layout plumbing (pad, transpose, pack, cast) --------
    mxu_dtype = jnp.bfloat16 if use_bf16 else jnp.float32
    if B_pad != B:
        x = jnp.pad(x, ((0, B_pad - B), (0, 0)))
    x_t = x.T.astype(mxu_dtype)                    # (F, B_pad): batch on lanes

    w1 = params["w1"].astype(mxu_dtype)            # (H, F)
    w2 = params["w2"].astype(mxu_dtype)            # (H, H)
    w3 = params["w3"].astype(mxu_dtype)            # (H, H)
    w4_col = params["w4"].astype(jnp.float32).T    # (H, 1) -- stays f32 (VPU)

    b4_col = jnp.zeros((H, 1), jnp.float32).at[0, 0].set(params["b4"][0])
    bias_pack = jnp.concatenate(
        [params["b1"][:, None], params["b2"][:, None],
         params["b3"][:, None], b4_col], axis=1).astype(jnp.float32)  # (H, 4)

    bcast = lambda i: (0, 0)                       # weights resident in VMEM

    in_specs = [
        pl.BlockSpec((F, tile), lambda i: (0, i)),  # x_t, tiled along lanes
        pl.BlockSpec((H, F), bcast),                # w1
        pl.BlockSpec((H, H), bcast),                # w2
        pl.BlockSpec((H, H), bcast),                # w3
        pl.BlockSpec((H, 1), bcast),                # w4 column (f32)
        pl.BlockSpec((H, 4), bcast),                # packed biases (f32)
    ]
    out_spec = pl.BlockSpec((1, tile), lambda i: (0, i))   # lane-dense output

    # NOTE: with F=32/H=64 each step needs < 1 MiB of VMEM even double-buffered,
    # so no explicit vmem_limit_bytes is required on any generation (incl. v7x).
    out_pad = pl.pallas_call(
        functools.partial(_mlp_value_kernel, mxu_dtype=mxu_dtype),
        out_shape=jax.ShapeDtypeStruct((1, B_pad), jnp.float32),
        grid_spec=pltpu.PrefetchScalarGridSpec(
            num_scalar_prefetch=0,
            grid=grid,
            in_specs=in_specs,
            out_specs=out_spec,
        ),
        compiler_params=pltpu.CompilerParams(
            dimension_semantics=("parallel",)),
    )(x_t, w1, w2, w3, w4_col, bias_pack)

    return out_pad[:, :B].T                        # (B, 1)


def init_params(key, num_feats, hidden=64):
    """PyTorch nn.Linear-style init and layout: w_i (out,in), b_i (out,),
    uniform(-1/sqrt(fan_in), 1/sqrt(fan_in))."""
    dims = [(hidden, num_feats), (hidden, hidden), (hidden, hidden), (1, hidden)]
    params = {}
    keys = jax.random.split(key, 2 * len(dims))
    for idx, (fan_out, fan_in) in enumerate(dims):
        bound = 1.0 / math.sqrt(float(fan_in))
        params[f"w{idx + 1}"] = jax.random.uniform(
            keys[2 * idx], (fan_out, fan_in), jnp.float32, -bound, bound)
        params[f"b{idx + 1}"] = jax.random.uniform(
            keys[2 * idx + 1], (fan_out,), jnp.float32, -bound, bound)
    return params


def reference_forward(x, params):
    """Pure-JAX reference identical to the PyTorch forward (y = x @ W.T + b)."""
    h = x
    for i in (1, 2, 3):
        h = jnp.maximum(h @ params[f"w{i}"].T + params[f"b{i}"], 0.0)
    return h @ params["w4"].T + params["b4"]


# TODO(synk): the module's dummy_param/device bookkeeping and the
# `type(state) != torch.Tensor` host-side conversion have no kernel equivalent.

if __name__ == "__main__":
    key = jax.random.PRNGKey(0)
    kx, kp, kx2 = jax.random.split(key, 3)

    # num_inputs = (32,): a batch of 16 states with 32 (one-hot-ish) features.
    B, F = 16, 32
    x = jax.random.uniform(kx, (B, F), jnp.float32)
    params = init_params(kp, F)
    ref = reference_forward(x, params)

    # f32 path (all generations).
    out = jax.block_until_ready(onehot_value_forward(x, params))
    assert out.shape == (B, 1)
    assert jnp.allclose(out, ref, atol=1e-5, rtol=1e-5), "f32 mismatch vs reference"

    # bf16-MXU-input path (v6e/v7x tuning); elementwise math stays f32.
    out_bf16 = jax.block_until_ready(onehot_value_forward(x, params, use_bf16=True))
    assert jnp.allclose(out_bf16, ref, atol=5e-2, rtol=5e-2), "bf16 mismatch vs reference"

    # Multi-tile grid: ragged batch, padded to lane multiples, 4 grid steps.
    B2 = 1000
    x2 = jax.random.uniform(kx2, (B2, F), jnp.float32)
    out2 = jax.block_until_ready(onehot_value_forward(x2, params, tile_b=256))
    ref2 = reference_forward(x2, params)
    assert out2.shape == (B2, 1)
    assert jnp.allclose(out2, ref2, atol=1e-4, rtol=1e-4), "multi-tile mismatch vs reference"

    print("KERNEL_OK")
</pallas_src>

<mosaic_0001>
module attributes {stable_mosaic.version = 11 : i64} {
  func.func @_mlp_value_kernel(%arg0: i32, %arg1: memref<32x128xf32, #tpu.memory_space<vmem>>, %arg2: memref<64x32xf32, #tpu.memory_space<vmem>>, %arg3: memref<64x64xf32, #tpu.memory_space<vmem>>, %arg4: memref<64x64xf32, #tpu.memory_space<vmem>>, %arg5: memref<64x1xf32, #tpu.memory_space<vmem>>, %arg6: memref<64x4xf32, #tpu.memory_space<vmem>>, %arg7: memref<1x128xf32, #tpu.memory_space<vmem>>) attributes {dimension_semantics = [#tpu.dimension_semantics<parallel>], iteration_bounds = array<i64: 1>, scalar_prefetch = 0 : i64, scratch_operands = 0 : i64, tpu.core_type = #tpu.core_type<tc>, window_params = [{transform_indices = @transform_0, window_bounds = array<i64: 32, 128>}, {pipeline_mode = #tpu.pipeline_mode<synchronous>, transform_indices = @transform_1, window_bounds = array<i64: 64, 32>}, {pipeline_mode = #tpu.pipeline_mode<synchronous>, transform_indices = @transform_2, window_bounds = array<i64: 64, 64>}, {pipeline_mode = #tpu.pipeline_mode<synchronous>, transform_indices = @transform_3, window_bounds = array<i64: 64, 64>}, {pipeline_mode = #tpu.pipeline_mode<synchronous>, transform_indices = @transform_4, window_bounds = array<i64: 64, 1>}, {pipeline_mode = #tpu.pipeline_mode<synchronous>, transform_indices = @transform_5, window_bounds = array<i64: 64, 4>}, {transform_indices = @transform_6, window_bounds = array<i64: 1, 128>}]} {
    %c0 = arith.constant 0 : index
    %c0_0 = arith.constant 0 : index
    %0 = vector.load %arg1[%c0, %c0_0] : memref<32x128xf32, #tpu.memory_space<vmem>>, vector<32x128xf32>
    %c0_1 = arith.constant 0 : index
    %c0_2 = arith.constant 0 : index
    %1 = vector.load %arg2[%c0_1, %c0_2] : memref<64x32xf32, #tpu.memory_space<vmem>>, vector<64x32xf32>
    %cst = arith.constant dense<0.000000e+00> : vector<64x128xf32>
    %2 = tpu.matmul %1, %0, %cst {dimension_numbers = #tpu.dot_dimension_numbers<[1], [0], [0], [1], [0, 0, 1, 1], [], []>} : vector<64x32xf32>, vector<32x128xf32>, vector<64x128xf32> -> vector<64x128xf32>
    %c0_3 = arith.constant 0 : index
    %c0_4 = arith.constant 0 : index
    %3 = vector.load %arg6[%c0_3, %c0_4] : memref<64x4xf32, #tpu.memory_space<vmem>>, vector<64x1xf32>
    %4 = vector.broadcast %3 : vector<64x1xf32> to vector<64x128xf32>
    %5 = arith.addf %2, %4 : vector<64x128xf32>
    %cst_5 = arith.constant 0.000000e+00 : f32
    %6 = vector.broadcast %cst_5 : f32 to vector<64x128xf32>
    %7 = arith.maximumf %5, %6 : vector<64x128xf32>
    %c0_6 = arith.constant 0 : index
    %c0_7 = arith.constant 0 : index
    %8 = vector.load %arg3[%c0_6, %c0_7] : memref<64x64xf32, #tpu.memory_space<vmem>>, vector<64x64xf32>
    %cst_8 = arith.constant dense<0.000000e+00> : vector<64x128xf32>
    %9 = tpu.matmul %8, %7, %cst_8 {dimension_numbers = #tpu.dot_dimension_numbers<[1], [0], [0], [1], [0, 0, 1, 1], [], []>} : vector<64x64xf32>, vector<64x128xf32>, vector<64x128xf32> -> vector<64x128xf32>
    %c0_9 = arith.constant 0 : index
    %c1 = arith.constant 1 : index
    %10 = vector.load %arg6[%c0_9, %c1] : memref<64x4xf32, #tpu.memory_space<vmem>>, vector<64x1xf32>
    %11 = vector.broadcast %10 : vector<64x1xf32> to vector<64x128xf32>
    %12 = arith.addf %9, %11 : vector<64x128xf32>
    %cst_10 = arith.constant 0.000000e+00 : f32
    %13 = vector.broadcast %cst_10 : f32 to vector<64x128xf32>
    %14 = arith.maximumf %12, %13 : vector<64x128xf32>
    %c0_11 = arith.constant 0 : index
    %c0_12 = arith.constant 0 : index
    %15 = vector.load %arg4[%c0_11, %c0_12] : memref<64x64xf32, #tpu.memory_space<vmem>>, vector<64x64xf32>
    %cst_13 = arith.constant dense<0.000000e+00> : vector<64x128xf32>
    %16 = tpu.matmul %15, %14, %cst_13 {dimension_numbers = #tpu.dot_dimension_numbers<[1], [0], [0], [1], [0, 0, 1, 1], [], []>} : vector<64x64xf32>, vector<64x128xf32>, vector<64x128xf32> -> vector<64x128xf32>
    %c0_14 = arith.constant 0 : index
    %c2 = arith.constant 2 : index
    %17 = vector.load %arg6[%c0_14, %c2] : memref<64x4xf32, #tpu.memory_space<vmem>>, vector<64x1xf32>
    %18 = vector.broadcast %17 : vector<64x1xf32> to vector<64x128xf32>
    %19 = arith.addf %16, %18 : vector<64x128xf32>
    %cst_15 = arith.constant 0.000000e+00 : f32
    %20 = vector.broadcast %cst_15 : f32 to vector<64x128xf32>
    %21 = arith.maximumf %19, %20 : vector<64x128xf32>
    %c0_16 = arith.constant 0 : index
    %c0_17 = arith.constant 0 : index
    %22 = vector.load %arg5[%c0_16, %c0_17] : memref<64x1xf32, #tpu.memory_space<vmem>>, vector<64x1xf32>
    %23 = vector.broadcast %22 : vector<64x1xf32> to vector<64x128xf32>
    %24 = arith.mulf %21, %23 : vector<64x128xf32>
    %cst_18 = arith.constant dense<0.000000e+00> : vector<128xf32>
    %25 = vector.multi_reduction <add>, %24, %cst_18 [0] : vector<64x128xf32> to vector<128xf32>
    %26 = vector.shape_cast %25 : vector<128xf32> to vector<1x128xf32>
    %c0_19 = arith.constant 0 : index
    %c3 = arith.constant 3 : index
    %27 = vector.load %arg6[%c0_19, %c3] : memref<64x4xf32, #tpu.memory_space<vmem>>, vector<1x1xf32>
    %28 = vector.broadcast %27 : vector<1x1xf32> to vector<1x128xf32>
    %29 = arith.addf %26, %28 : vector<1x128xf32>
    %c0_20 = arith.constant 0 : index
    %c0_21 = arith.constant 0 : index
    %30 = vector.load %arg7[%c0_20, %c0_21] : memref<1x128xf32, #tpu.memory_space<vmem>>, vector<1x128xf32>
    tpu.vector_store %arg7[%c0_20, %c0_21], %29 {strides = array<i32>} : memref<1x128xf32, #tpu.memory_space<vmem>>, vector<1x128xf32>,
    return
  }
  func.func @transform_0(%arg0: i32) -> (i32, i32) {
    %c0_i32 = arith.constant 0 : i32
    %c0_i32_0 = arith.constant 0 : i32
    return %c0_i32, %arg0 : i32, i32
  }
  func.func @transform_1(%arg0: i32) -> (i32, i32) {
    %c0_i32 = arith.constant 0 : i32
    %c0_i32_0 = arith.constant 0 : i32
    %c0_i32_1 = arith.constant 0 : i32
    return %c0_i32, %c0_i32_0 : i32, i32
  }
  func.func @transform_2(%arg0: i32) -> (i32, i32) {
    %c0_i32 = arith.constant 0 : i32
    %c0_i32_0 = arith.constant 0 : i32
    %c0_i32_1 = arith.constant 0 : i32
    return %c0_i32, %c0_i32_0 : i32, i32
  }
  func.func @transform_3(%arg0: i32) -> (i32, i32) {
    %c0_i32 = arith.constant 0 : i32
    %c0_i32_0 = arith.constant 0 : i32
    %c0_i32_1 = arith.constant 0 : i32
    return %c0_i32, %c0_i32_0 : i32, i32
  }
  func.func @transform_4(%arg0: i32) -> (i32, i32) {
    %c0_i32 = arith.constant 0 : i32
    %c0_i32_0 = arith.constant 0 : i32
    %c0_i32_1 = arith.constant 0 : i32
    return %c0_i32, %c0_i32_0 : i32, i32
  }
  func.func @transform_5(%arg0: i32) -> (i32, i32) {
    %c0_i32 = arith.constant 0 : i32
    %c0_i32_0 = arith.constant 0 : i32
    %c0_i32_1 = arith.constant 0 : i32
    return %c0_i32, %c0_i32_0 : i32, i32
  }
  func.func @transform_6(%arg0: i32) -> (i32, i32) {
    %c0_i32 = arith.constant 0 : i32
    %c0_i32_0 = arith.constant 0 : i32
    return %c0_i32, %arg0 : i32, i32
  }
}

</mosaic_0001>

<bundles_post_ra>
// kernel: onehot_value_forward.1
= control target key start
LH: loop header
LB: loop body
LE: loop exit
PB: predicated region body
PF: predicated region fallthrough
CT: control target
= control target key end

     0   :  { %vm83_vm0 = vcmask 261120   ;;  %v833_v2 = vmov 0   ;;  %vm261_vm1 = vcmask 523264   ;;  %v834_v22 = vmov 1   ;;  %s1079_s0 = inlined_call_operand.vmem [shape: f32[32,128], index: 0, kind: input, shape index: {}]   ;;  %s1080_s1 = inlined_call_operand.vmem [shape: f32[64,32], index: 1, kind: input, shape index: {}]   ;;  %s1081_s5 = inlined_call_operand.vmem [shape: f32[64,4], index: 5, kind: input, shape index: {}]   ;;  %s1082_s2 = inlined_call_operand.vmem [shape: f32[64,64], index: 2, kind: input, shape index: {}]   ;;  %s1083_s3 = inlined_call_operand.vmem [shape: f32[64,64], index: 3, kind: input, shape index: {}]   ;;  %s1084_s4 = inlined_call_operand.vmem [shape: f32[64,1], index: 4, kind: input, shape index: {}]   ;;  %s1085_s6 = inlined_call_operand.vmem [shape: f32[1,128], index: 6, kind: output, shape index: {}]  }
   0x1   :  { %v26_v0 = vld [vmem:[%s1079_s0 + $0x18] sm:$0xff]  ;;  %v25_v1 = vld [vmem:[%s1079_s0 + $0x10] sm:$0xff]  ;;  %821 = vset.pattern.permute.xlu0 %v833_v2  ;;  %822 = vset.pattern.permute.xlu1 %v833_v2  ;;  %v27_v3 = vld [vmem:[%s1080_s1] sm:$0xff] }
   0x2   :  { %725 = vmatprep.subr.mxu0 %v26_v0  ;;  %v24_v4 = vld [vmem:[%s1079_s0 + $0x8] sm:$0xff]  ;;  %733 = vmatprep.mubr.msk.f32.mxu0 %vm83_vm0, %v27_v3  ;;  %v23_v5 = vld [vmem:[%s1079_s0] sm:$0xff]  ;;  %v893_v6 = vld [vmem:[%s1081_s5 + $0x38] sm:$0xff] }
   0x3   :  { %726 = vmatpush3.msra.mxu0 %v26_v0  ;;  %v898_v7 = vld [vmem:[%s1081_s5 + $0x28] sm:$0xff]  ;;  %80 = vperm.xlu0 %821, %v893_v6   ;;  %v908_v9 = vld [vmem:[%s1081_s5 + $0x30] sm:$0xff]  ;;  %v916_v11 = vld [vmem:[%s1081_s5 + $0x20] sm:$0xff]  ;;  %v835_v0 = vmov 2  }
   0x4   :  { %727 = vmatprep.subr.mxu0 %v25_v1  ;;  %v28_v8 = vld [vmem:[%s1080_s1 + $0x8] sm:$0xff]  ;;  %70 = vperm.xlu1 %822, %v898_v7   ;;  %v29_v10 = vld [vmem:[%s1080_s1 + $0x10] sm:$0xff]  ;;  %v30_v12 = vld [vmem:[%s1080_s1 + $0x18] sm:$0xff] }
   0x5   :  { %728 = vmatpush3.msra.mxu0 %v25_v1  ;;  %v928_v13 = vld [vmem:[%s1081_s5 + $0x18] sm:$0xff]  ;;  %v31_v14 = vld [vmem:[%s1080_s1 + $0x20] sm:$0xff]  ;;  %v936_v15 = vld [vmem:[%s1081_s5 + $0x10] sm:$0xff] }
   0x6   :  { %729 = vmatprep.subr.mxu0 %v24_v4  ;;  %v32_v16 = vld [vmem:[%s1080_s1 + $0x28] sm:$0xff]  ;;  %v33_v18 = vld [vmem:[%s1080_s1 + $0x30] sm:$0xff]  ;;  %v956_v19 = vld [vmem:[%s1081_s5] sm:$0xff] }
   0x7   :  { %730 = vmatpush3.msra.mxu0 %v24_v4  ;;  %75 = vperm.xlu0 %821, %v908_v9   ;;  %v948_v17 = vld [vmem:[%s1081_s5 + $0x8] sm:$0xff]  ;;  %v34_v20 = vld [vmem:[%s1080_s1 + $0x38] sm:$0xff]  ;;  %v221_v21 = vld [vmem:[%s1082_s2] sm:$0xff] }
   0x8   :  { %731 = vmatprep.subr.mxu0 %v23_v5  ;;  %65 = vperm.xlu1 %822, %v916_v11   ;;  %v222_v55 = vld [vmem:[%s1082_s2 + $0x8] sm:$0xff]  ;;  %v223_v56 = vld [vmem:[%s1082_s2 + $0x10] sm:$0xff]  ;;  %v224_v57 = vld [vmem:[%s1082_s2 + $0x18] sm:$0xff] }
   0x9   :  { %732 = vmatpush3.msra.mxu0 %v23_v5  ;;  %761 = vmatprep.mubr.msk.f32.mxu1 %vm261_vm1, %v221_v21  ;;  %v225_v58 = vld [vmem:[%s1082_s2 + $0x20] sm:$0xff]  ;;  %v226_v59 = vld [vmem:[%s1082_s2 + $0x28] sm:$0xff]  ;;  %v227_v60 = vld [vmem:[%s1082_s2 + $0x30] sm:$0xff] }
   0xa   :  { %734 = vmatmul.mubr.msk.f32.vlgmr.msra.gmra.mxu0 %vm83_vm0, %v28_v8  ;;  %v228_v61 = vld [vmem:[%s1082_s2 + $0x38] sm:$0xff]  ;;  %v399_v62 = vld [vmem:[%s1083_s3] sm:$0xff]  ;;  %v405_v63 = vld [vmem:[%s1083_s3 + $0x30] sm:$0xff] }
   0xb   :  { %736 = vmatprep.mubr.msk.f32.mxu0 %vm83_vm0, %v29_v10  ;;  %60 = vperm.xlu0 %821, %v928_v13   ;;  %v576_v1 = vld [vmem:[%s1084_s4] sm:$0xff]  ;;  %v578_v3 = vld [vmem:[%s1084_s4 + $0x10] sm:$0xff]  ;;  %v577_v4 = vld [vmem:[%s1084_s4 + $0x8] sm:$0xff] }
   0xc   :  { %55 = vperm.xlu1 %822, %v936_v15   ;;  %v579_v5 = vld [vmem:[%s1084_s4 + $0x18] sm:$0xff]  ;;  %v580_v8 = vld [vmem:[%s1084_s4 + $0x20] sm:$0xff]  ;;  %v581_v10 = vld [vmem:[%s1084_s4 + $0x28] sm:$0xff] }
   0xe   :  { %737 = vmatmul.mubr.msk.f32.gmra.mxu0 %vm83_vm0, %v30_v12  ;;  %v583_v12 = vld [vmem:[%s1084_s4 + $0x38] sm:$0xff] }
   0xf   :  { %739 = vmatprep.mubr.msk.f32.mxu0 %vm83_vm0, %v31_v14  ;;  %50 = vperm.xlu0 %821, %v948_v17  }
  0x10   :  { %45 = vperm.xlu1 %822, %v956_v19  }
  0x12   :  { %740 = vmatmul.mubr.msk.f32.gmra.mxu0 %vm83_vm0, %v32_v16 }
  0x13   :  { %742 = vmatprep.mubr.msk.f32.mxu0 %vm83_vm0, %v33_v18  ;;  %823 = vset.pattern.permute.xlu0 %v834_v22 }
  0x14   :  { %824 = vset.pattern.permute.xlu1 %v834_v22  ;;  %258 = vperm.xlu0 %823, %v893_v6  }
  0x15   :  { %254 = vperm.xlu1 %824, %v908_v9  }
  0x16   :  { %743 = vmatmul.mubr.msk.f32.gmra.mxu0 %vm83_vm0, %v34_v20 }
  0x17   :  { %789 = vmatprep.mubr.msk.f32.mxu0 %vm261_vm1, %v399_v62 }
  0x18   :  { %246 = vperm.xlu0 %823, %v916_v11  }
  0x19   :  { %250 = vperm.xlu1 %824, %v898_v7  }
  0x1c   :  { %238 = vperm.xlu0 %823, %v936_v15  }
  0x1d   :  { %242 = vperm.xlu1 %824, %v928_v13  }
  0x20   :  { %230 = vperm.xlu0 %823, %v956_v19  }
  0x21   :  { %234 = vperm.xlu1 %824, %v948_v17  }
  0x24   :  { %826 = vset.pattern.permute.xlu0 %v835_v0 }
  0x25   :  { %825 = vset.pattern.permute.xlu1 %v835_v0  ;;  %412 = vperm.xlu0 %826, %v948_v17  }
  0x26   :  { %408 = vperm.xlu1 %825, %v956_v19  }
  0x29   :  { %827 = vset.pattern.permute.xlu0 %v833_v2 }
  0x2a   :  { %416 = vperm.xlu1 %825, %v936_v15   ;;  %586 = vperm.xlu0 %827, %v576_v1  }
  0x2e   :  { %420 = vperm.xlu1 %825, %v928_v13   ;;  %596 = vperm.xlu0 %827, %v578_v3   ;;  %v836_v13 = vmov 3  }
  0x32   :  { %828 = vset.pattern.permute.xlu1 %v833_v2  ;;  %601 = vperm.xlu0 %827, %v579_v5  }
  0x33   :  { %591 = vperm.xlu1 %828, %v577_v4  }
  0x36   :  { %606 = vperm.xlu0 %827, %v580_v8  }
  0x37   :  { %829 = vset.pattern.permute.xlu1 %v835_v0 }
  0x38   :  { %424 = vperm.xlu1 %829, %v916_v11   ;;  %v582_v11 = vld [vmem:[%s1084_s4 + $0x30] sm:$0xff] }
  0x3a   :  { %611 = vperm.xlu0 %827, %v581_v10  }
  0x3c   :  { %428 = vperm.xlu1 %829, %v898_v7   ;;  %v645_v7 = vld [vmem:[%s1081_s5] sm:$0x1] }
  0x3e   :  { %621 = vperm.xlu0 %827, %v583_v12  }
  0x40   :  { %432 = vperm.xlu1 %829, %v908_v9  }
  0x42   :  { %832 = vset.pattern.permute.xlu0 %v836_v13 }
  0x44   :  { %436 = vperm.xlu1 %829, %v893_v6  }
  0x48   :  { %830 = vset.pattern.permute.xlu1 %v833_v2 }
  0x49   :  { %616 = vperm.xlu1 %830, %v582_v11  }
  0x4d   :  { %831 = vset.pattern.permute.xlu1 %v836_v13 }
  0x4e   :  { %648 = vperm.xlu1 %831, %v645_v7  }
  0x7e   :  { %v81_v24 = vpop.permute.xlu0 %80 }
  0x7f   :  { %v71_v26 = vpop.permute.xlu1 %70 }
  0x82   :  { %v76_v29 = vpop.permute.xlu0 %75 }
  0x83   :  { %v66_v31 = vpop.permute.xlu1 %65 }
  0x86   :  { %v61_v35 = vpop.permute.xlu0 %60 }
  0x87   :  { %v56_v40 = vpop.permute.xlu1 %55 }
  0x8a   :  { %v51_v45 = vpop.permute.xlu0 %50 }
  0x8b   :  { %v46_v48 = vpop.permute.xlu1 %45 }
  0x8f   :  { %v259_v16 = vpop.permute.xlu0 %258 }
  0x90   :  { %v255_v15 = vpop.permute.xlu1 %254 }
  0x93   :  { %v247_v20 = vpop.permute.xlu0 %246 }
  0x94   :  { %v251_v6 = vpop.permute.xlu1 %250 }
  0x98   :  { %v243_v2 = vpop.permute.xlu1 %242 }
  0xca   :  { %v735_v23 = vpop.f32.mrf.mxu0 }
  0xcb   :  { %v180_v49 = vadd.f32 %v735_v23, %v51_v45  ;;  %v401_v45 = vld [vmem:[%s1083_s3 + $0x10] sm:$0xff] }
  0xcc   :  { %v174_v25 = vpop.f32.mrf.mxu0 }
  0xcd   :  { %v175_v51 = vadd.f32 %v174_v25, %v46_v48  ;;  %v214_v53 = vmax.f32 %v180_v49, 0.0  ;;  %v404_v48 = vld [vmem:[%s1083_s3 + $0x28] sm:$0xff] }
  0xce   :  { %v738_v27 = vpop.f32.mrf.mxu0 }
  0xcf   :  { %v190_v43 = vadd.f32 %v738_v27, %v61_v35  ;;  %v213_v54 = vmax.f32 %v175_v51, 0.0 }
  0xd0   :  { %v184_v28 = vpop.f32.mrf.mxu0 }
  0xd1   :  { %v185_v46 = vadd.f32 %v184_v28, %v56_v40  ;;  %v216_v50 = vmax.f32 %v190_v43, 0.0  ;;  %v239_v28 = vpop.permute.xlu0 %238  ;;  %v400_v43 = vld [vmem:[%s1083_s3 + $0x8] sm:$0xff] }
  0xd2   :  { %v741_v30 = vpop.f32.mrf.mxu0 }
  0xd3   :  { %v200_v37 = vadd.f32 %v741_v30, %v71_v26  ;;  %v215_v52 = vmax.f32 %v185_v46, 0.0  ;;  %v402_v46 = vld [vmem:[%s1083_s3 + $0x18] sm:$0xff] }
  0xd4   :  { %v194_v32 = vpop.f32.mrf.mxu0 }
  0xd5   :  { %v195_v41 = vadd.f32 %v194_v32, %v66_v31  ;;  %v218_v44 = vmax.f32 %v200_v37, 0.0 }
  0xd6   :  { %v744_v33 = vpop.f32.mrf.mxu0 }
  0xd7   :  { %v210_v34 = vadd.f32 %v744_v33, %v81_v24  ;;  %v217_v47 = vmax.f32 %v195_v41, 0.0  ;;  %v235_v33 = vpop.permute.xlu1 %234 }
  0xd8   :  { %v204_v36 = vpop.f32.mrf.mxu0 }
  0xd9   :  { %v220_v38 = vmax.f32 %v210_v34, 0.0  ;;  %v205_v39 = vadd.f32 %v204_v36, %v76_v29  ;;  %v231_v36 = vpop.permute.xlu0 %230 }
  0xdb   :  { %v219_v42 = vmax.f32 %v205_v39, 0.0  ;;  %745 = vmatprep.subr.mxu1 %v220_v38  ;;  %v409_v49 = vpop.permute.xlu1 %408 }
  0xdc   :  { %746 = vmatpush3.msra.mxu1 %v220_v38 }
  0xdd   :  { %747 = vmatprep.subr.mxu1 %v219_v42 }
  0xde   :  { %748 = vmatpush3.msra.mxu1 %v219_v42 }
  0xdf   :  { %749 = vmatprep.subr.mxu1 %v218_v44 }
  0xe0   :  { %750 = vmatpush3.msra.mxu1 %v218_v44  ;;  %v406_v44 = vld [vmem:[%s1083_s3 + $0x38] sm:$0xff] }
  0xe1   :  { %751 = vmatprep.subr.mxu1 %v217_v47 }
  0xe2   :  { %752 = vmatpush3.msra.mxu1 %v217_v47  ;;  %v403_v47 = vld [vmem:[%s1083_s3 + $0x20] sm:$0xff] }
  0xe3   :  { %753 = vmatprep.subr.mxu1 %v216_v50 }
  0xe4   :  { %754 = vmatpush3.msra.mxu1 %v216_v50  ;;  %v417_v50 = vpop.permute.xlu1 %416 }
  0xe5   :  { %755 = vmatprep.subr.mxu1 %v215_v52 }
  0xe6   :  { %756 = vmatpush3.msra.mxu1 %v215_v52  ;;  %v413_v52 = vpop.permute.xlu0 %412 }
  0xe7   :  { %757 = vmatprep.subr.mxu1 %v214_v53 }
  0xe8   :  { %758 = vmatpush3.msra.mxu1 %v214_v53  ;;  %v421_v51 = vpop.permute.xlu1 %420 }
  0xe9   :  { %759 = vmatprep.subr.mxu1 %v213_v54 }
  0xea   :  { %760 = vmatpush3.msra.mxu1 %v213_v54  ;;  %v587_v54 = vpop.permute.xlu0 %586 }
  0xeb   :  { %762 = vmatmul.mubr.msk.f32.vlgmr.msra.gmra.mxu1 %vm261_vm1, %v222_v55 }
  0xec   :  { %764 = vmatprep.mubr.msk.f32.mxu1 %vm261_vm1, %v223_v56  ;;  %v592_v53 = vpop.permute.xlu1 %591 }
  0xee   :  { %v597_v56 = vpop.permute.xlu0 %596 }
  0xef   :  { %765 = vmatmul.mubr.msk.f32.gmra.mxu1 %vm261_vm1, %v224_v57 }
  0xf0   :  { %767 = vmatprep.mubr.msk.f32.mxu1 %vm261_vm1, %v225_v58  ;;  %v425_v55 = vpop.permute.xlu1 %424 }
  0xf3   :  { %768 = vmatmul.mubr.msk.f32.gmra.mxu1 %vm261_vm1, %v226_v59  ;;  %v602_v59 = vpop.permute.xlu0 %601 }
  0xf4   :  { %770 = vmatprep.mubr.msk.f32.mxu1 %vm261_vm1, %v227_v60  ;;  %v429_v57 = vpop.permute.xlu1 %428 }
  0xf7   :  { %771 = vmatmul.mubr.msk.f32.gmra.mxu1 %vm261_vm1, %v228_v61  ;;  %v607_v10 = vpop.permute.xlu0 %606 }
  0xf8   :  { %798 = vmatprep.mubr.msk.f32.mxu1 %vm261_vm1, %v405_v63  ;;  %v433_v62 = vpop.permute.xlu1 %432 }
 0x1ab   :  { %v763_v14 = vpop.f32.mrf.mxu1 }
 0x1ac   :  { %v358_v37 = vadd.f32 %v763_v14, %v235_v33  ;;  %v437_v14 = vpop.permute.xlu1 %436 }
 0x1ad   :  { %v352_v9 = vpop.f32.mrf.mxu1 }
 0x1ae   :  { %v353_v39 = vadd.f32 %v352_v9, %v231_v36  ;;  %v392_v41 = vmax.f32 %v358_v37, 0.0 }
 0x1af   :  { %v766_v17 = vpop.f32.mrf.mxu1 }
 0x1b0   :  { %v368_v31 = vadd.f32 %v766_v17, %v243_v2  ;;  %v391_v42 = vmax.f32 %v353_v39, 0.0 }
 0x1b1   :  { %v362_v18 = vpop.f32.mrf.mxu1 }
 0x1b2   :  { %v363_v34 = vadd.f32 %v362_v18, %v239_v28  ;;  %v394_v38 = vmax.f32 %v368_v31, 0.0 }
 0x1b3   :  { %v769_v19 = vpop.f32.mrf.mxu1 }
 0x1b4   :  { %v378_v25 = vadd.f32 %v769_v19, %v251_v6  ;;  %v393_v40 = vmax.f32 %v363_v34, 0.0 }
 0x1b5   :  { %v372_v21 = vpop.f32.mrf.mxu1 }
 0x1b6   :  { %v373_v29 = vadd.f32 %v372_v21, %v247_v20  ;;  %v396_v32 = vmax.f32 %v378_v25, 0.0 }
 0x1b7   :  { %v772_v22 = vpop.f32.mrf.mxu1 }
 0x1b8   :  { %v388_v23 = vadd.f32 %v772_v22, %v259_v16  ;;  %v395_v35 = vmax.f32 %v373_v29, 0.0 }
 0x1b9   :  { %v382_v24 = vpop.f32.mrf.mxu1 }
 0x1ba   :  { %v398_v26 = vmax.f32 %v388_v23, 0.0  ;;  %v383_v27 = vadd.f32 %v382_v24, %v255_v15 }
 0x1bc   :  { %v397_v30 = vmax.f32 %v383_v27, 0.0  ;;  %773 = vmatprep.subr.mxu0 %v398_v26  ;;  %801 = vmatprep.subr.mxu1 %v398_v26 }
 0x1bd   :  { %774 = vmatpush3.msra.mxu0 %v398_v26  ;;  %809 = vmatpush3.msra.mxu1 %v398_v26  ;;  %v612_v26 = vpop.permute.xlu0 %611 }
 0x1be   :  { %775 = vmatprep.subr.mxu0 %v397_v30  ;;  %802 = vmatprep.subr.mxu1 %v397_v30 }
 0x1bf   :  { %776 = vmatpush3.msra.mxu0 %v397_v30  ;;  %810 = vmatpush3.msra.mxu1 %v397_v30  ;;  %v617_v30 = vpop.permute.xlu1 %616 }
 0x1c0   :  { %777 = vmatprep.subr.mxu0 %v396_v32  ;;  %803 = vmatprep.subr.mxu1 %v396_v32 }
 0x1c1   :  { %778 = vmatpush3.msra.mxu0 %v396_v32  ;;  %811 = vmatpush3.msra.mxu1 %v396_v32  ;;  %v622_v36 = vpop.permute.xlu0 %621 }
 0x1c2   :  { %779 = vmatprep.subr.mxu0 %v395_v35  ;;  %804 = vmatprep.subr.mxu1 %v395_v35 }
 0x1c3   :  { %780 = vmatpush3.msra.mxu0 %v395_v35  ;;  %812 = vmatpush3.msra.mxu1 %v395_v35 }
 0x1c4   :  { %781 = vmatprep.subr.mxu0 %v394_v38  ;;  %805 = vmatprep.subr.mxu1 %v394_v38 }
 0x1c5   :  { %782 = vmatpush3.msra.mxu0 %v394_v38  ;;  %813 = vmatpush3.msra.mxu1 %v394_v38 }
 0x1c6   :  { %783 = vmatprep.subr.mxu0 %v393_v40  ;;  %806 = vmatprep.subr.mxu1 %v393_v40 }
 0x1c7   :  { %784 = vmatpush3.msra.mxu0 %v393_v40  ;;  %814 = vmatpush3.msra.mxu1 %v393_v40 }
 0x1c8   :  { %785 = vmatprep.subr.mxu0 %v392_v41  ;;  %807 = vmatprep.subr.mxu1 %v392_v41 }
 0x1c9   :  { %786 = vmatpush3.msra.mxu0 %v392_v41  ;;  %815 = vmatpush3.msra.mxu1 %v392_v41 }
 0x1ca   :  { %787 = vmatprep.subr.mxu0 %v391_v42  ;;  %808 = vmatprep.subr.mxu1 %v391_v42 }
 0x1cb   :  { %788 = vmatpush3.msra.mxu0 %v391_v42  ;;  %816 = vmatpush3.msra.mxu1 %v391_v42 }
 0x1cc   :  { %790 = vmatmul.mubr.msk.f32.vlgmr.msra.gmra.mxu0 %vm261_vm1, %v400_v43  ;;  %799 = vmatmul.mubr.msk.f32.vlgmr.msra.gmra.mxu1 %vm261_vm1, %v406_v44 }
 0x1cd   :  { %792 = vmatprep.mubr.msk.f32.mxu0 %vm261_vm1, %v401_v45  ;;  %v649_v45 = vpop.permute.xlu1 %648 }
 0x1d0   :  { %793 = vmatmul.mubr.msk.f32.gmra.mxu0 %vm261_vm1, %v402_v46 }
 0x1d1   :  { %795 = vmatprep.mubr.msk.f32.mxu0 %vm261_vm1, %v403_v47 }
 0x1d4   :  { %796 = vmatmul.mubr.msk.f32.gmra.mxu0 %vm261_vm1, %v404_v48 }
 0x28c   :  { %v791_v58 = vpop.f32.mrf.mxu0  ;;  %v800_v0 = vpop.f32.mrf.mxu1 }
 0x28d   :  { %v535_v60 = vadd.f32 %v791_v58, %v413_v52  ;;  %v565_v22 = vadd.f32 %v800_v0, %v437_v14 }
 0x28e   :  { %v529_v61 = vpop.f32.mrf.mxu0  ;;  %v559_v11 = vpop.f32.mrf.mxu1 }
 0x28f   :  { %v530_v63 = vadd.f32 %v529_v61, %v409_v49  ;;  %v569_v3 = vmax.f32 %v535_v60, 0.0  ;;  %v560_v19 = vadd.f32 %v559_v11, %v433_v62  ;;  %v575_v31 = vmax.f32 %v565_v22, 0.0 }
 0x290   :  { %v794_v1 = vpop.f32.mrf.mxu0 }
 0x291   :  { %v568_v4 = vmax.f32 %v530_v63, 0.0  ;;  %v545_v5 = vadd.f32 %v794_v1, %v421_v51  ;;  %v625_v15 = vmul.f32 %v592_v53, %v569_v3  ;;  %v574_v27 = vmax.f32 %v560_v19, 0.0 }
 0x292   :  { %v539_v8 = vpop.f32.mrf.mxu0  ;;  %v631_v37 = vmul.f32 %v622_v36, %v575_v31 }
 0x293   :  { %v624_v12 = vmul.f32 %v587_v54, %v568_v4  ;;  %v540_v13 = vadd.f32 %v539_v8, %v417_v50  ;;  %v571_v9 = vmax.f32 %v545_v5, 0.0  ;;  %v630_v34 = vmul.f32 %v617_v30, %v574_v27 }
 0x294   :  { %v797_v7 = vpop.f32.mrf.mxu0 }
 0x295   :  { %v570_v16 = vmax.f32 %v540_v13, 0.0  ;;  %v555_v17 = vadd.f32 %v797_v7, %v429_v57  ;;  %v632_v6 = vadd.f32 %v625_v15, %v624_v12  ;;  %v627_v23 = vmul.f32 %v602_v59, %v571_v9 }
 0x296   :  { %v549_v18 = vpop.f32.mrf.mxu0 }
 0x297   :  { %v626_v20 = vmul.f32 %v597_v56, %v570_v16  ;;  %v550_v21 = vadd.f32 %v549_v18, %v425_v55  ;;  %v573_v24 = vmax.f32 %v555_v17, 0.0 }
 0x299   :  { %v633_v2 = vadd.f32 %v632_v6, %v626_v20  ;;  %v572_v25 = vmax.f32 %v550_v21, 0.0  ;;  %v629_v32 = vmul.f32 %v612_v26, %v573_v24 }
 0x29b   :  { %v628_v28 = vmul.f32 %v607_v10, %v572_v25  ;;  %v634_v29 = vadd.f32 %v633_v2, %v627_v23 }
 0x29d   :  { %v635_v33 = vadd.f32 %v634_v29, %v628_v28 }
 0x29f   :  { %v636_v35 = vadd.f32 %v635_v33, %v629_v32 }
 0x2a1   :  { %v637_v38 = vadd.f32 %v636_v35, %v630_v34 }
 0x2a3   :  { %v638_v39 = vadd.f32 %v637_v38, %v631_v37 }
 0x2a5   :  { %v639_v40 = vrot.slane %v638_v39, 4 }
 0x2a7   :  { %v640_v41 = vadd.f32 %v639_v40, %v638_v39 }
 0x2a9   :  { %v641_v42 = vrot.slane %v640_v41, 2 }
 0x2ab   :  { %v642_v43 = vadd.f32 %v641_v42, %v640_v41 }
 0x2ad   :  { %v643_v44 = vrot.slane %v642_v43, 1 }
 0x2af   :  { %v644_v46 = vadd.f32 %v643_v44, %v642_v43 }
 0x2b1   :  { %v651_v47 = vadd.f32 %v649_v45, %v644_v46 }
 0x2b3   :  { %652 = vst [vmem:[%s1085_s6] sm:$0x1] %v651_v47 }

</bundles_post_ra>
